<compile_context>
chip_gen: v7x
topology: tpu7x:2x2x1
jax: 0.10.0
libtpu: 0.0.40
codegen_flags: <defaults>
</compile_context>

<pallas_src>
import functools
import math

import jax
import jax.numpy as jnp
from jax.experimental import pallas as pl
from jax.experimental.pallas import tpu as pltpu


# --------------------------- config (synthetic) ---------------------------
FEATURE_DIM = 16
ACTION_DIM = 4
HIDDEN1 = 32
HIDDEN2 = 8
MAX_SIGMA = 0.7
MIN_SIGMA = 0.01

_HALF = 64                      # mu branch -> lanes [0,64), sigma -> [64,128)
_LANES = 2 * _HALF              # 128
_LOG_SQRT_2PI = math.log(math.sqrt(2.0 * math.pi))


def _round_up(n, m):
    return ((n + m - 1) // m) * m


# ------------------------------ Pallas kernel ------------------------------
def _policy_kernel(p_ref, x_ref, eps_ref, out_ref, *,
                   f_pad, min_sigma, max_sigma, matmul_dtype):
    r1 = f_pad            # start of fused layer-2 weights
    r2 = r1 + _LANES      # start of fused layer-3 weights
    r3 = r2 + _LANES      # start of bias block

    x = x_ref[...]
    w1 = p_ref[0:r1, :]
    w2 = p_ref[r1:r2, :]
    w3 = p_ref[r2:r3, :]
    bias = p_ref[r3:r3 + 8, :]
    b1 = bias[0:1, :]
    b2 = bias[1:2, :]
    b3 = bias[2:3, :]

    cd = matmul_dtype

    # Fused mu/sigma MLP: 3 matmuls; mu branch in lanes [0,64), sigma in [64,128).
    h = jnp.dot(x.astype(cd), w1.astype(cd),
                preferred_element_type=jnp.float32) + b1
    h = jnp.maximum(h, 0.0)                                    # ReLU
    h = jnp.dot(h.astype(cd), w2.astype(cd),
                preferred_element_type=jnp.float32) + b2
    h = jnp.maximum(h, 0.0)                                    # ReLU
    h = jnp.dot(h.astype(cd), w3.astype(cd),
                preferred_element_type=jnp.float32) + b3

    mu_raw = h[:, 0:_HALF]
    sg_raw = h[:, _HALF:_LANES]

    mu = (jnp.tanh(mu_raw) + 1.0) * 0.5
    sigma = (jnp.tanh(sg_raw) + 1.0) * 0.5
    sigma = jnp.clip(sigma, min_sigma, max_sigma)

    # Normal(mu, sigma).sample() == mu + sigma * eps, eps ~ N(0,1) (host-drawn).
    eps = eps_ref[...]
    action = mu + sigma * eps

    # filter = |action - 0.5| >= 0.5
    filt = jnp.abs(action - 0.5) >= 0.5
    # NOTE: matches the PyTorch expression exactly: (a + 3*sigma - mu) * ((1/6)*sigma)
    remapped = (action + 3.0 * sigma - mu) * ((1.0 / 6.0) * sigma)
    action = jnp.where(filt, remapped, action)

    # Normal(mu, sigma).log_prob(action); divide via EUP reciprocal.
    inv_sigma = pl.reciprocal(sigma)
    z = (action - mu) * inv_sigma
    log_prob = -0.5 * z * z - jnp.log(sigma) - _LOG_SQRT_2PI

    # One lane-dense (TILE_B, 128) store: action | log_prob.
    out_ref[...] = jnp.concatenate([action, log_prob], axis=-1)


# ------------------------------ param packing ------------------------------
def pack_params(params_mu, params_sigma):
    """Pack both 3-layer MLPs into one (R, 128) f32 array.

    Lane layout: mu branch in cols [0,64), sigma branch in cols [64,128).
    Row layout:
      [0, f_pad)               : fused layer-1 weights (x @ .)
      [f_pad, f_pad+128)       : fused layer-2 weights (block diagonal)
      [f_pad+128, f_pad+256)   : fused layer-3 weights (block diagonal)
      [f_pad+256, f_pad+264)   : biases (row 0: b1, row 1: b2, row 2: b3)
    """
    (w1m, b1m), (w2m, b2m), (w3m, b3m) = params_mu
    (w1s, b1s), (w2s, b2s), (w3s, b3s) = params_sigma
    F, H1 = w1m.shape
    H2 = w2m.shape[1]
    A = w3m.shape[1]
    assert max(H1, H2, A) <= _HALF, "hidden/action dims must fit in 64 lanes"

    f_pad = _round_up(F, 8)
    r1, r2, r3 = f_pad, f_pad + _LANES, f_pad + 2 * _LANES
    p = jnp.zeros((r3 + 8, _LANES), jnp.float32)
    # layer 1: concatenated along output lanes
    p = p.at[0:F, 0:H1].set(w1m)
    p = p.at[0:F, _HALF:_HALF + H1].set(w1s)
    # layer 2: block diagonal
    p = p.at[r1:r1 + H1, 0:H2].set(w2m)
    p = p.at[r1 + _HALF:r1 + _HALF + H1, _HALF:_HALF + H2].set(w2s)
    # layer 3: block diagonal
    p = p.at[r2:r2 + H2, 0:A].set(w3m)
    p = p.at[r2 + _HALF:r2 + _HALF + H2, _HALF:_HALF + A].set(w3s)
    # biases
    p = p.at[r3, 0:H1].set(b1m.reshape(-1))
    p = p.at[r3, _HALF:_HALF + H1].set(b1s.reshape(-1))
    p = p.at[r3 + 1, 0:H2].set(b2m.reshape(-1))
    p = p.at[r3 + 1, _HALF:_HALF + H2].set(b2s.reshape(-1))
    p = p.at[r3 + 2, 0:A].set(b3m.reshape(-1))
    p = p.at[r3 + 2, _HALF:_HALF + A].set(b3s.reshape(-1))
    return p, f_pad


# --------------------------------- wrapper ---------------------------------
def policy_forward(x, params_mu, params_sigma, eps,
                   min_sigma=MIN_SIGMA, max_sigma=MAX_SIGMA,
                   matmul_dtype=jnp.float32):
    """PolicyNetwork forward pass. Returns (action, log_prob).

    Set matmul_dtype=jnp.bfloat16 for large-batch MXU-bound runs; the f32
    default keeps reference numerics (elementwise math is always f32).
    """
    B, F = x.shape
    A = params_mu[-1][0].shape[1]

    packed, f_pad = pack_params(params_mu, params_sigma)
    rows = packed.shape[0]

    # Pad features to the packed layout and noise to the mu-branch lane width.
    x_p = x if F == f_pad else jnp.pad(x, ((0, 0), (0, f_pad - F)))
    eps_p = jnp.pad(eps, ((0, 0), (0, _HALF - A)))

    # Batch tiling: one tile up to 1024 rows; 512-row auto-pipelined tiles beyond.
    tile_b = _round_up(B, 8) if B <= 1024 else 512
    b_pad = _round_up(B, tile_b)
    if b_pad != B:
        x_p = jnp.pad(x_p, ((0, b_pad - B), (0, 0)))
        eps_p = jnp.pad(eps_p, ((0, b_pad - B), (0, 0)))

    kernel = functools.partial(
        _policy_kernel, f_pad=f_pad,
        min_sigma=min_sigma, max_sigma=max_sigma, matmul_dtype=matmul_dtype)

    out = pl.pallas_call(
        kernel,
        out_shape=jax.ShapeDtypeStruct((b_pad, _LANES), jnp.float32),
        grid_spec=pltpu.PrefetchScalarGridSpec(
            num_scalar_prefetch=0,
            grid=(b_pad // tile_b,),
            in_specs=[
                # Packed params: constant block -> DMA'd once, VMEM-resident.
                pl.BlockSpec((rows, _LANES), lambda i: (0, 0)),
                pl.BlockSpec((tile_b, f_pad), lambda i: (i, 0)),
                pl.BlockSpec((tile_b, _HALF), lambda i: (i, 0)),
            ],
            out_specs=pl.BlockSpec((tile_b, _LANES), lambda i: (i, 0)),
        ),
        compiler_params=pltpu.CompilerParams(
            dimension_semantics=("parallel",)),   # batch axis across TCs (v7x)
    )(packed, x_p, eps_p)

    action = out[:B, 0:A]
    log_prob = out[:B, _HALF:_HALF + A]
    return action, log_prob


# --------------------------- deterministic params ---------------------------
def _init_linear(key, fan_in, fan_out):
    """PyTorch-style Linear init (uniform +/- 1/sqrt(fan_in)), weight as (in, out)."""
    kw, kb = jax.random.split(key)
    bound = 1.0 / math.sqrt(fan_in)
    w = jax.random.uniform(kw, (fan_in, fan_out), jnp.float32, -bound, bound)
    b = jax.random.uniform(kb, (1, fan_out), jnp.float32, -bound, bound)
    return w, b


def init_policy_params(key, feature_dim, action_dim):
    dims = [(feature_dim, HIDDEN1), (HIDDEN1, HIDDEN2), (HIDDEN2, action_dim)]
    keys = jax.random.split(key, 2 * len(dims))
    params_mu = [_init_linear(keys[i], *dims[i]) for i in range(3)]
    params_sigma = [_init_linear(keys[3 + i], *dims[i]) for i in range(3)]
    return params_mu, params_sigma


# ------------------------------ JAX reference ------------------------------
def _reference_forward(x, params_mu, params_sigma, eps, min_sigma, max_sigma):
    hi = jax.lax.Precision.HIGHEST

    def mlp(p):
        (w1, b1), (w2, b2), (w3, b3) = p
        h = jnp.maximum(jnp.dot(x, w1, precision=hi) + b1, 0.0)
        h = jnp.maximum(jnp.dot(h, w2, precision=hi) + b2, 0.0)
        return jnp.dot(h, w3, precision=hi) + b3

    mu = (jnp.tanh(mlp(params_mu)) + 1.0) * 0.5
    sigma = jnp.clip((jnp.tanh(mlp(params_sigma)) + 1.0) * 0.5,
                     min_sigma, max_sigma)
    action = mu + sigma * eps
    filt = jnp.abs(action - 0.5) >= 0.5
    action = jnp.where(
        filt, (action + 3.0 * sigma - mu) * ((1.0 / 6.0) * sigma), action)
    log_prob = (-((action - mu) ** 2) / (2.0 * sigma * sigma)
                - jnp.log(sigma) - _LOG_SQRT_2PI)
    return action, log_prob


# ----------------------------------- main -----------------------------------
if __name__ == "__main__":
    key = jax.random.PRNGKey(0)
    k_param, k_x, k_eps = jax.random.split(key, 3)

    B = 8
    x = jax.random.normal(k_x, (B, FEATURE_DIM), jnp.float32)
    # Standard-normal noise for the reparameterized Normal.sample()
    eps = jax.random.normal(k_eps, (B, ACTION_DIM), jnp.float32)

    params_mu, params_sigma = init_policy_params(k_param, FEATURE_DIM, ACTION_DIM)

    action, log_prob = policy_forward(x, params_mu, params_sigma, eps)
    jax.block_until_ready((action, log_prob))

    assert action.shape == (B, ACTION_DIM)
    assert log_prob.shape == (B, ACTION_DIM)
    assert bool(jnp.all(jnp.isfinite(action)))
    assert bool(jnp.all(jnp.isfinite(log_prob)))

    # Cross-check the fused/packed kernel against a plain-JAX reference.
    ref_a, ref_lp = _reference_forward(x, params_mu, params_sigma, eps,
                                       MIN_SIGMA, MAX_SIGMA)
    assert bool(jnp.allclose(action, ref_a, atol=2e-3, rtol=2e-3))
    assert bool(jnp.allclose(log_prob, ref_lp, atol=2e-3, rtol=2e-3))

    print("KERNEL_OK")
</pallas_src>

<mosaic_0001>
module attributes {stable_mosaic.version = 11 : i64} {
  func.func @_policy_kernel(%arg0: i32, %arg1: memref<280x128xf32, #tpu.memory_space<vmem>>, %arg2: memref<8x16xf32, #tpu.memory_space<vmem>>, %arg3: memref<8x64xf32, #tpu.memory_space<vmem>>, %arg4: memref<8x128xf32, #tpu.memory_space<vmem>>) attributes {dimension_semantics = [#tpu.dimension_semantics<parallel>], iteration_bounds = array<i64: 1>, scalar_prefetch = 0 : i64, scratch_operands = 0 : i64, tpu.core_type = #tpu.core_type<tc>, window_params = [{pipeline_mode = #tpu.pipeline_mode<synchronous>, transform_indices = @transform_0, window_bounds = array<i64: 280, 128>}, {transform_indices = @transform_1, window_bounds = array<i64: 8, 16>}, {transform_indices = @transform_2, window_bounds = array<i64: 8, 64>}, {transform_indices = @transform_3, window_bounds = array<i64: 8, 128>}]} {
    %c0 = arith.constant 0 : index
    %c0_0 = arith.constant 0 : index
    %0 = vector.load %arg2[%c0, %c0_0] : memref<8x16xf32, #tpu.memory_space<vmem>>, vector<8x16xf32>
    %c0_1 = arith.constant 0 : index
    %c0_2 = arith.constant 0 : index
    %1 = vector.load %arg1[%c0_1, %c0_2] : memref<280x128xf32, #tpu.memory_space<vmem>>, vector<16x128xf32>
    %c16 = arith.constant 16 : index
    %c0_3 = arith.constant 0 : index
    %2 = vector.load %arg1[%c16, %c0_3] : memref<280x128xf32, #tpu.memory_space<vmem>>, vector<128x128xf32>
    %c144 = arith.constant 144 : index
    %c0_4 = arith.constant 0 : index
    %3 = vector.load %arg1[%c144, %c0_4] : memref<280x128xf32, #tpu.memory_space<vmem>>, vector<128x128xf32>
    %c272 = arith.constant 272 : index
    %c0_5 = arith.constant 0 : index
    %4 = vector.load %arg1[%c272, %c0_5] : memref<280x128xf32, #tpu.memory_space<vmem>>, vector<8x128xf32>
    %5 = vector.extract_strided_slice %4 {offsets = [0, 0], sizes = [1, 128], strides = [1, 1]} : vector<8x128xf32> to vector<1x128xf32>
    %6 = vector.extract_strided_slice %4 {offsets = [1, 0], sizes = [1, 128], strides = [1, 1]} : vector<8x128xf32> to vector<1x128xf32>
    %7 = vector.extract_strided_slice %4 {offsets = [2, 0], sizes = [1, 128], strides = [1, 1]} : vector<8x128xf32> to vector<1x128xf32>
    %cst = arith.constant dense<0.000000e+00> : vector<8x128xf32>
    %8 = tpu.matmul %0, %1, %cst {dimension_numbers = #tpu.dot_dimension_numbers<[1], [0], [0], [1], [0, 0, 1, 1], [], []>} : vector<8x16xf32>, vector<16x128xf32>, vector<8x128xf32> -> vector<8x128xf32>
    %9 = vector.broadcast %5 : vector<1x128xf32> to vector<8x128xf32>
    %10 = arith.addf %8, %9 : vector<8x128xf32>
    %cst_6 = arith.constant 0.000000e+00 : f32
    %11 = vector.broadcast %cst_6 : f32 to vector<8x128xf32>
    %12 = arith.maximumf %10, %11 : vector<8x128xf32>
    %cst_7 = arith.constant dense<0.000000e+00> : vector<8x128xf32>
    %13 = tpu.matmul %12, %2, %cst_7 {dimension_numbers = #tpu.dot_dimension_numbers<[1], [0], [0], [1], [0, 0, 1, 1], [], []>} : vector<8x128xf32>, vector<128x128xf32>, vector<8x128xf32> -> vector<8x128xf32>
    %14 = vector.broadcast %6 : vector<1x128xf32> to vector<8x128xf32>
    %15 = arith.addf %13, %14 : vector<8x128xf32>
    %cst_8 = arith.constant 0.000000e+00 : f32
    %16 = vector.broadcast %cst_8 : f32 to vector<8x128xf32>
    %17 = arith.maximumf %15, %16 : vector<8x128xf32>
    %cst_9 = arith.constant dense<0.000000e+00> : vector<8x128xf32>
    %18 = tpu.matmul %17, %3, %cst_9 {dimension_numbers = #tpu.dot_dimension_numbers<[1], [0], [0], [1], [0, 0, 1, 1], [], []>} : vector<8x128xf32>, vector<128x128xf32>, vector<8x128xf32> -> vector<8x128xf32>
    %19 = vector.broadcast %7 : vector<1x128xf32> to vector<8x128xf32>
    %20 = arith.addf %18, %19 : vector<8x128xf32>
    %21 = vector.extract_strided_slice %20 {offsets = [0, 0], sizes = [8, 64], strides = [1, 1]} : vector<8x128xf32> to vector<8x64xf32>
    %22 = vector.extract_strided_slice %20 {offsets = [0, 64], sizes = [8, 64], strides = [1, 1]} : vector<8x128xf32> to vector<8x64xf32>
    %23 = math.tanh %21 : vector<8x64xf32>
    %cst_10 = arith.constant 1.000000e+00 : f32
    %24 = vector.broadcast %cst_10 : f32 to vector<8x64xf32>
    %25 = arith.addf %23, %24 : vector<8x64xf32>
    %cst_11 = arith.constant 5.000000e-01 : f32
    %26 = vector.broadcast %cst_11 : f32 to vector<8x64xf32>
    %27 = arith.mulf %25, %26 : vector<8x64xf32>
    %28 = math.tanh %22 : vector<8x64xf32>
    %cst_12 = arith.constant 1.000000e+00 : f32
    %29 = vector.broadcast %cst_12 : f32 to vector<8x64xf32>
    %30 = arith.addf %28, %29 : vector<8x64xf32>
    %cst_13 = arith.constant 5.000000e-01 : f32
    %31 = vector.broadcast %cst_13 : f32 to vector<8x64xf32>
    %32 = arith.mulf %30, %31 : vector<8x64xf32>
    %cst_14 = arith.constant 0.00999999977 : f32
    %cst_15 = arith.constant 0.699999988 : f32
    %33 = vector.broadcast %cst_14 : f32 to vector<8x64xf32>
    %34 = arith.maximumf %33, %32 : vector<8x64xf32>
    %35 = vector.broadcast %cst_15 : f32 to vector<8x64xf32>
    %36 = arith.minimumf %35, %34 : vector<8x64xf32>
    %c0_16 = arith.constant 0 : index
    %c0_17 = arith.constant 0 : index
    %37 = vector.load %arg3[%c0_16, %c0_17] : memref<8x64xf32, #tpu.memory_space<vmem>>, vector<8x64xf32>
    %38 = arith.mulf %36, %37 : vector<8x64xf32>
    %39 = arith.addf %27, %38 : vector<8x64xf32>
    %cst_18 = arith.constant 5.000000e-01 : f32
    %40 = vector.broadcast %cst_18 : f32 to vector<8x64xf32>
    %41 = arith.subf %39, %40 : vector<8x64xf32>
    %42 = math.absf %41 : vector<8x64xf32>
    %cst_19 = arith.constant 5.000000e-01 : f32
    %43 = vector.broadcast %cst_19 : f32 to vector<8x64xf32>
    %44 = arith.cmpf oge, %42, %43 : vector<8x64xf32>
    %cst_20 = arith.constant 3.000000e+00 : f32
    %45 = vector.broadcast %cst_20 : f32 to vector<8x64xf32>
    %46 = arith.mulf %45, %36 : vector<8x64xf32>
    %47 = arith.addf %39, %46 : vector<8x64xf32>
    %48 = arith.subf %47, %27 : vector<8x64xf32>
    %cst_21 = arith.constant 0.166666672 : f32
    %49 = vector.broadcast %cst_21 : f32 to vector<8x64xf32>
    %50 = arith.mulf %49, %36 : vector<8x64xf32>
    %51 = arith.mulf %48, %50 : vector<8x64xf32>
    %52 = arith.select %44, %51, %39 : vector<8x64xi1>, vector<8x64xf32>
    %53 = tpu.reciprocal %36 : vector<8x64xf32> -> vector<8x64xf32>
    %54 = arith.subf %52, %27 : vector<8x64xf32>
    %55 = arith.mulf %54, %53 : vector<8x64xf32>
    %cst_22 = arith.constant -5.000000e-01 : f32
    %56 = vector.broadcast %cst_22 : f32 to vector<8x64xf32>
    %57 = arith.mulf %56, %55 : vector<8x64xf32>
    %58 = arith.mulf %57, %55 : vector<8x64xf32>
    %59 = math.log %36 : vector<8x64xf32>
    %60 = arith.subf %58, %59 : vector<8x64xf32>
    %cst_23 = arith.constant 0.918938517 : f32
    %61 = vector.broadcast %cst_23 : f32 to vector<8x64xf32>
    %62 = arith.subf %60, %61 : vector<8x64xf32>
    %63 = tpu.concatenate %52, %62 in 1 : vector<8x64xf32>, vector<8x64xf32> -> vector<8x128xf32>
    %c0_24 = arith.constant 0 : index
    %c0_25 = arith.constant 0 : index
    %64 = vector.load %arg4[%c0_24, %c0_25] : memref<8x128xf32, #tpu.memory_space<vmem>>, vector<8x128xf32>
    tpu.vector_store %arg4[%c0_24, %c0_25], %63 {strides = array<i32>} : memref<8x128xf32, #tpu.memory_space<vmem>>, vector<8x128xf32>,
    return
  }
  func.func @transform_0(%arg0: i32) -> (i32, i32) {
    %c0_i32 = arith.constant 0 : i32
    %c0_i32_0 = arith.constant 0 : i32
    %c0_i32_1 = arith.constant 0 : i32
    return %c0_i32, %c0_i32_0 : i32, i32
  }
  func.func @transform_1(%arg0: i32) -> (i32, i32) {
    %c0_i32 = arith.constant 0 : i32
    %c0_i32_0 = arith.constant 0 : i32
    return %arg0, %c0_i32 : i32, i32
  }
  func.func @transform_2(%arg0: i32) -> (i32, i32) {
    %c0_i32 = arith.constant 0 : i32
    %c0_i32_0 = arith.constant 0 : i32
    return %arg0, %c0_i32 : i32, i32
  }
  func.func @transform_3(%arg0: i32) -> (i32, i32) {
    %c0_i32 = arith.constant 0 : i32
    %c0_i32_0 = arith.constant 0 : i32
    return %arg0, %c0_i32 : i32, i32
  }
}

</mosaic_0001>

<bundles_post_ra>
// kernel: tpu_custom_call.1
= control target key start
LH: loop header
LB: loop body
LE: loop exit
PB: predicated region body
PF: predicated region fallthrough
CT: control target
= control target key end

     0   :  { %8 = vsyncpa [#allocation3], 0  ;;  %s779_s0 = inlined_call_operand.hbm [shape: f32[280,128], index: 0, kind: input, shape index: {}]   ;;  %s780_s1 = inlined_call_operand.hbm [shape: f32[8,16], index: 1, kind: input, shape index: {}]   ;;  %s781_s2 = inlined_call_operand.hbm [shape: f32[8,64], index: 2, kind: input, shape index: {}]   ;;  %s782_s3 = inlined_call_operand.hbm [shape: f32[8,128], index: 3, kind: output, shape index: {}]  }
   0x1   :  { %9 = vsyncpa [#allocation6], 0 }
   0x2   :  { %10 = vsyncpa [#allocation4], 0  ;;  %s667_s12 = smov [#allocation5]   ;;  %s668_s14 = smov [#allocation2]  }
   0x3   :  { %s29_s13 = sshll.u32 %s667_s12, 4  ;;  %s16_s15 = sshll.u32 %s668_s14, 4  ;;  %s30_s13 = int_to_ptr.vmem [resolvable:$true] %s29_s13  ;;  %s697_s15 = int_to_ptr.vmem [resolvable:$true] %s16_s15 }
   0x4   :  { %s573_s18 = scalar_lea.hbm %s780_s1, 128 }
   0x5   :  { %p574_p0 = scmp.ne.s32.totalorder %s780_s1, %s573_s18  ;;  %p577_p1 = scmp.lt.u32.totalorder %s573_s18, %s780_s1 }
   0x7   :  { %p579_p2 = pnand %p577_p1, %p574_p0 }
   0x9   :  { %582 = shalt.err (!%p579_p2)
}
   0xa   :  { %s583_s23 = scalar_lea.vmem %s30_s13, 128  ;;  %p588_p4 = scmp.lt.s32.totalorder %s30_s13, %s30_s13 }
   0xb   :  { %p584_p3 = scmp.ne.s32.totalorder %s30_s13, %s583_s23  ;;  %p589_p5 = scmp.lt.s32.totalorder %s583_s23, %s583_s23 }
   0xd   :  { %p590_p6 = por %p589_p5, %p588_p4 }
   0xf   :  { %p591_p7 = pnand %p590_p6, %p584_p3 }
  0x11   :  { %594 = shalt.err (!%p591_p7)
}
  0x12   :  { %32 = dma.hbm_to_vmem [thread:$0]  %s780_s1, 128, %s30_s13, [#allocation6]  }
  0x13   :  { %s595_s28 = scalar_lea.hbm %s779_s0, 4480 }
  0x14   :  { %p596_p8 = scmp.ne.s32.totalorder %s779_s0, %s595_s28  ;;  %p599_p9 = scmp.lt.u32.totalorder %s595_s28, %s779_s0 }
  0x16   :  { %p601_p10 = pnand %p599_p9, %p596_p8 }
  0x18   :  { %604 = shalt.err (!%p601_p10)
}
  0x19   :  { %s605_s6 = scalar_lea.vmem %s697_s15, 4480  ;;  %p610_p12 = scmp.lt.s32.totalorder %s697_s15, %s697_s15 }
  0x1a   :  { %p606_p11 = scmp.ne.s32.totalorder %s697_s15, %s605_s6  ;;  %p611_p13 = scmp.lt.s32.totalorder %s605_s6, %s605_s6 }
  0x1c   :  { %p612_p0 = por %p611_p13, %p610_p12 }
  0x1e   :  { %p613_p1 = pnand %p612_p0, %p606_p11 }
  0x20   :  { %616 = shalt.err (!%p613_p1)
}
  0x21   :  { %s669_s1 = smov 128   ;;  %s670_s7 = smov 8  }
  0x22   :  { %22 = dma.hbm_to_vmem [thread:$0]  %s779_s0, 4480, %s697_s15, [#allocation3], %s669_s1, %s669_s1, %s670_s7  }
  0x23   :  { %s671_s10 = smov [#allocation7]   ;;  %s617_s14 = scalar_lea.hbm %s781_s2, 128 }
  0x24   :  { %s39_s11 = sshll.u32 %s671_s10, 4  ;;  %p618_p2 = scmp.ne.s32.totalorder %s781_s2, %s617_s14  ;;  %s40_s11 = int_to_ptr.vmem [resolvable:$true] %s39_s11 }
  0x25   :  { %p621_p3 = scmp.lt.u32.totalorder %s617_s14, %s781_s2 }
  0x27   :  { %p623_p4 = pnand %p621_p3, %p618_p2 }
  0x29   :  { %626 = shalt.err (!%p623_p4)
}
  0x2a   :  { %s627_s20 = scalar_lea.vmem %s40_s11, 128  ;;  %p632_p6 = scmp.lt.s32.totalorder %s40_s11, %s40_s11 }
  0x2b   :  { %p628_p5 = scmp.ne.s32.totalorder %s40_s11, %s627_s20  ;;  %p633_p7 = scmp.lt.s32.totalorder %s627_s20, %s627_s20 }
  0x2d   :  { %p634_p8 = por %p633_p7, %p632_p6 }
  0x2f   :  { %p635_p9 = pnand %p634_p8, %p628_p5 }
  0x31   :  { %638 = shalt.err (!%p635_p9)
}
  0x32   :  { %42 = dma.hbm_to_vmem [thread:$0]  %s781_s2, 128, %s40_s11, [#allocation6]  }
  0x33   :  { %661 = dma.done.wait [#allocation3], 4480  }
  0x34   :  { %662 = vsyncadd [#allocation3], 4294962816 }
  0x35   :  { %663 = dma.done.wait [#allocation6], 256  }
  0x36   :  { %664 = vsyncadd [#allocation6], 4294967040  ;;  %v672_v0 = vmov 0.0|0.0   ;;  %vm673_vm0 = vmmov 0   ;;  %v674_v1 = vmov 0.0   ;;  %v53_v2 = vld [vmem:[#allocation2] sm:$0xff]  ;;  %v88_v51 = vlaneseq }
  0x37   :  { %506 = vmatprep.subr.bf16.mxu0 %v672_v0  ;;  %433 = vmatprep.mubr.msk.f32.mxu0 %vm673_vm0, %v674_v1  ;;  %v54_v3 = vld [vmem:[#allocation2 + $0x8] sm:$0xff]  ;;  %v55_v5 = vld [vmem:[#allocation2 + $0x10] sm:$0xff]  ;;  %v56_v6 = vld [vmem:[#allocation2 + $0x18] sm:$0xff]  ;;  %vm92_vm1 = vcmask 130048   ;;  %s675_s2 = smov 64   ;;  %s676_s21 = smov [#allocation8]  }
  0x38   :  { %509 = vmatprep.subr.bf16.mxu1 %v672_v0  ;;  %468 = vmatprep.mubr.msk.f32.mxu1 %vm673_vm0, %v674_v1  ;;  %v507_v4 = vpack.c.bf16 %v54_v3, %v53_v2  ;;  %v57_v7 = vld [vmem:[#allocation2 + $0x20] sm:$0xff]  ;;  %v510_v8 = vpack.c.bf16 %v56_v6, %v55_v5  ;;  %v58_v9 = vld [vmem:[#allocation2 + $0x28] sm:$0xff]  ;;  %v52_v10 = vld [vmem:[#allocation5] sm:$0xff]  ;;  %v89_v52 = vshrl.u32 %v88_v51, 7  ;;  %s379_s22 = sshll.u32 %s676_s21, 4  ;;  %vm370_vm3 = vcmask 523264   ;;  %s380_s22 = int_to_ptr.vmem [resolvable:$true] %s379_s22 }
  0x39   :  { %v513_v11 = vpack.c.bf16 %v58_v9, %v57_v7  ;;  %v59_v12 = vld [vmem:[#allocation2 + $0x30] sm:$0xff]  ;;  %v60_v13 = vld [vmem:[#allocation2 + $0x38] sm:$0xff]  ;;  %v61_v15 = vld [vmem:[#allocation2 + $0x40] sm:$0xff]  ;;  %s639_s23 = scalar_lea.vmem %s380_s22, 128  ;;  %p644_p11 = scmp.lt.s32.totalorder %s380_s22, %s380_s22 }
  0x3a   :  { %508 = vmatpush3.bf16.msra.mxu0 %v507_v4  ;;  %511 = vmatpush3.bf16.msra.mxu1 %v510_v8  ;;  %v516_v14 = vpack.c.bf16 %v60_v13, %v59_v12  ;;  %v62_v16 = vld [vmem:[#allocation2 + $0x48] sm:$0xff]  ;;  %v63_v18 = vld [vmem:[#allocation2 + $0x50] sm:$0xff]  ;;  %v64_v19 = vld [vmem:[#allocation2 + $0x58] sm:$0xff]  ;;  %v90_v53 = vsub.s32 0, %v89_v52  ;;  %v244_v6 = vsub.s32 2, %v89_v52  ;;  %p640_p10 = scmp.ne.s32.totalorder %s380_s22, %s639_s23  ;;  %p645_p12 = scmp.lt.s32.totalorder %s639_s23, %s639_s23 }
  0x3b   :  { %533 = vmatprep.subr.bf16.mxu0 %v672_v0  ;;  %512 = vmatprep.subr.bf16.mxu1 %v672_v0  ;;  %v519_v17 = vpack.c.bf16 %v62_v16, %v61_v15  ;;  %v522_v20 = vpack.c.bf16 %v64_v19, %v63_v18  ;;  %v65_v21 = vld [vmem:[#allocation2 + $0x60] sm:$0xff]  ;;  %v66_v22 = vld [vmem:[#allocation2 + $0x68] sm:$0xff]  ;;  %v67_v24 = vld [vmem:[#allocation2 + $0x70] sm:$0xff] }
  0x3c   :  { %v525_v23 = vpack.c.bf16 %v66_v22, %v65_v21  ;;  %v68_v25 = vld [vmem:[#allocation2 + $0x78] sm:$0xff]  ;;  %v69_v27 = vld [vmem:[#allocation2 + $0x80] sm:$0xff]  ;;  %v70_v28 = vld [vmem:[#allocation2 + $0x88] sm:$0xff]  ;;  %p646_p13 = por %p645_p12, %p644_p11 }
  0x3d   :  { %434 = vmatmul.mubr.msk.f32.vlgmr.msra.gmra.mrb[0].mxu0 %vm92_vm1, %v52_v10  ;;  %v528_v26 = vpack.c.bf16 %v68_v25, %v67_v24  ;;  %v531_v29 = vpack.c.bf16 %v70_v28, %v69_v27  ;;  %v71_v30 = vld [vmem:[#allocation2 + $0x90] sm:$0xff]  ;;  %v72_v31 = vld [vmem:[#allocation2 + $0x98] sm:$0xff]  ;;  %v73_v32 = vld [vmem:[#allocation2 + $0xa0] sm:$0xff] }
  0x3e   :  { %503 = vmatprep.mubr.msk.f32.mxu0 %vm673_vm0, %v674_v1  ;;  %514 = vmatpush3.bf16.msra.mxu1 %v513_v11  ;;  %v534_v33 = vpack.c.bf16 %v72_v31, %v71_v30  ;;  %v74_v34 = vld [vmem:[#allocation2 + $0xa8] sm:$0xff]  ;;  %v75_v36 = vld [vmem:[#allocation2 + $0xb0] sm:$0xff]  ;;  %v76_v37 = vld [vmem:[#allocation2 + $0xb8] sm:$0xff]  ;;  %v169_v1 = vsub.s32 1, %v89_v52  ;;  %p647_p0 = pnand %p646_p13, %p640_p10 }
  0x3f   :  { %515 = vmatprep.subr.bf16.mxu1 %v672_v0  ;;  %v537_v35 = vpack.c.bf16 %v74_v34, %v73_v32  ;;  %v540_v38 = vpack.c.bf16 %v76_v37, %v75_v36  ;;  %v77_v39 = vld [vmem:[#allocation2 + $0xc0] sm:$0xff]  ;;  %v78_v40 = vld [vmem:[#allocation2 + $0xc8] sm:$0xff]  ;;  %v79_v42 = vld [vmem:[#allocation2 + $0xd0] sm:$0xff] }
  0x40   :  { %535 = vmatpush3.bf16.msra.mxu0 %v534_v33  ;;  %v543_v41 = vpack.c.bf16 %v78_v40, %v77_v39  ;;  %v80_v43 = vld [vmem:[#allocation2 + $0xd8] sm:$0xff]  ;;  %v81_v45 = vld [vmem:[#allocation2 + $0xe0] sm:$0xff]  ;;  %v82_v46 = vld [vmem:[#allocation2 + $0xe8] sm:$0xff] }
  0x41   :  { %536 = vmatprep.subr.bf16.mxu0 %v672_v0  ;;  %v546_v44 = vpack.c.bf16 %v80_v43, %v79_v42  ;;  %v549_v47 = vpack.c.bf16 %v82_v46, %v81_v45  ;;  %v83_v48 = vld [vmem:[#allocation2 + $0xf0] sm:$0xff]  ;;  %v84_v49 = vld [vmem:[#allocation2 + $0xf8] sm:$0xff]  ;;  %v85_v60 = vld [vmem:[#allocation2 + $0x100] sm:$0xff] }
  0x42   :  { %517 = vmatpush3.bf16.msra.mxu1 %v516_v14  ;;  %v552_v50 = vpack.c.bf16 %v84_v49, %v83_v48  ;;  %v87_v54 = vld [vmem:[#allocation2 + $0x110] sm:$0xff]  ;;  %v86_v61 = vld [vmem:[#allocation2 + $0x108] sm:$0xff]  ;;  %v321_v63 = vld [vmem:[#allocation7] sm:$0xff] }
  0x43   :  { %518 = vmatprep.subr.bf16.mxu1 %v672_v0  ;;  %v91_v55 = vrot.slane %v87_v54, %v90_v53  ;;  %v555_v62 = vpack.c.bf16 %v86_v61, %v85_v60  ;;  %323 = vrot.lane.b32.xlu0 %v321_v63, %s675_s2  ;;  %v245_v7 = vrot.slane %v87_v54, %v244_v6 }
  0x44   :  { %538 = vmatpush3.bf16.msra.mxu0 %v537_v35 }
  0x45   :  { %539 = vmatprep.subr.bf16.mxu0 %v672_v0 }
  0x46   :  { %520 = vmatpush3.bf16.msra.mxu1 %v519_v17 }
  0x47   :  { %521 = vmatprep.subr.bf16.mxu1 %v672_v0 }
  0x48   :  { %541 = vmatpush3.bf16.msra.mxu0 %v540_v38 }
  0x49   :  { %542 = vmatprep.subr.bf16.mxu0 %v672_v0 }
  0x4a   :  { %523 = vmatpush3.bf16.msra.mxu1 %v522_v20 }
  0x4b   :  { %524 = vmatprep.subr.bf16.mxu1 %v672_v0 }
  0x4c   :  { %544 = vmatpush3.bf16.msra.mxu0 %v543_v41 }
  0x4d   :  { %545 = vmatprep.subr.bf16.mxu0 %v672_v0 }
  0x4e   :  { %526 = vmatpush3.bf16.msra.mxu1 %v525_v23 }
  0x4f   :  { %527 = vmatprep.subr.bf16.mxu1 %v672_v0 }
  0x50   :  { %547 = vmatpush3.bf16.msra.mxu0 %v546_v44 }
  0x51   :  { %548 = vmatprep.subr.bf16.mxu0 %v672_v0 }
  0x52   :  { %529 = vmatpush3.bf16.msra.mxu1 %v528_v26 }
  0x53   :  { %530 = vmatprep.subr.bf16.mxu1 %v672_v0 }
  0x54   :  { %550 = vmatpush3.bf16.msra.mxu0 %v549_v47 }
  0x55   :  { %551 = vmatprep.subr.bf16.mxu0 %v672_v0 }
  0x56   :  { %532 = vmatpush3.bf16.msra.mxu1 %v531_v29 }
  0x58   :  { %553 = vmatpush3.bf16.msra.mxu0 %v552_v50 }
  0x59   :  { %554 = vmatprep.subr.bf16.mxu0 %v672_v0  ;;  %v170_v0 = vrot.slane %v87_v54, %v169_v1 }
  0x5c   :  { %556 = vmatpush3.bf16.msra.mxu0 %v555_v62 }
  0xb5   :  { %v324_v15 = vpop.permute.xlu0 %323 }
 0x110   :  { %v162_v56 = vpop.f32.mrb[0].mxu0 }
 0x111   :  { %v163_v57 = vadd.f32 %v162_v56, %v91_v55  ;;  %v435_v58 = vpop.f32.mrb[1].mxu0 }
 0x113   :  { %v166_v59 = vmax.f32 %v163_v57, 0.0 }
 0x115   :  { %469 = vmatmul.mubr.f32.vlgmr.msra.gmra.mrb[0].mxu1 %v166_v59 }
 0x1e8   :  { %v237_v2 = vpop.f32.mrb[0].mxu1 }
 0x1e9   :  { %v238_v3 = vadd.f32 %v237_v2, %v170_v0  ;;  %v470_v4 = vpop.f32.mrb[1].mxu1 }
 0x1eb   :  { %v241_v5 = vmax.f32 %v238_v3, 0.0 }
 0x1ed   :  { %504 = vmatmul.mubr.f32.vlgmr.msra.gmra.mrb[2].mxu0 %v241_v5 }
 0x2c0   :  { %v312_v8 = vpop.f32.mrb[2].mxu0 }
 0x2c1   :  { %v313_v9 = vadd.f32 %v312_v8, %v245_v7  ;;  %v505_v10 = vpop.f32.mrb[3].mxu0 }
 0x2c3   :  { %567 = vtanh.f32 %v313_v9 }
 0x2cd   :  { %v568_v11 = vpop.eup %567 }
 0x2ce   :  { %v317_v12 = vadd.f32 1.0, %v568_v11 }
 0x2d0   :  { %v318_v13 = vmul.f32 0.5, %v317_v12 }
 0x2d2   :  { %v319_v14 = vmax.f32 %v318_v13, 0.01 }
 0x2d4   :  { %v320_v16 = vmin.f32 %v319_v14, 0.7 }
 0x2d6   :  { %v326_v17 = vmul.f32 %v324_v15, %v320_v16  ;;  %v335_v18 = vmul.f32 3.0, %v320_v16  ;;  %569 = vrcp.f32 %v320_v16  ;;  %v342_v19 = vmul.f32 0.16666667, %v320_v16 }
 0x2d7   :  { %571 = vlog2.f32 %v320_v16 }
 0x2d8   :  { %337 = vrot.lane.b32.xlu1 %v335_v18, %s675_s2  ;;  %328 = vrot.lane.b32.xlu0 %v326_v17, %s675_s2 }
 0x2dc   :  { %344 = vrot.lane.b32.xlu1 %v342_v19, %s675_s2 }
 0x2e0   :  { %v570_v20 = vpop.eup %569 }
 0x2e1   :  { %v572_v21 = vpop.eup %571  ;;  %352 = vrot.lane.b32.xlu0 %v570_v20, %s675_s2 }
 0x2e2   :  { %v359_v22 = vmul.f32 0.6931472, %v572_v21 }
 0x2e4   :  { %361 = vrot.lane.b32.xlu1 %v359_v22, %s675_s2 }
 0x34a   :  { %v338_v23 = vpop.permute.xlu1 %337  ;;  %v329_v24 = vpop.permute.xlu0 %328 }
 0x34b   :  { %v331_v25 = vadd.f32 %v329_v24, %v318_v13 }
 0x34d   :  { %v390_v26 = vadd.f32 -0.5, %v331_v25  ;;  %v340_v27 = vadd.f32 %v338_v23, %v331_v25 }
 0x34e   :  { %v345_v30 = vpop.permute.xlu1 %344 }
 0x34f   :  { %v333_v28 = vand.u32 2147483647, %v390_v26  ;;  %v341_v29 = vsub.f32 %v340_v27, %v318_v13 }
 0x351   :  { %v347_v31 = vmul.f32 %v345_v30, %v341_v29  ;;  %vm334_vm2 = vcmp.ge.f32.partialorder %v333_v28, 0.5 }
 0x353   :  { %v348_v32 = vsel %vm334_vm2, %v347_v31, %v331_v25  ;;  %v353_v34 = vpop.permute.xlu0 %352 }
 0x354   :  { %v350_v33 = vsub.f32 %v348_v32, %v318_v13 }
 0x356   :  { %v355_v35 = vmul.f32 %v353_v34, %v350_v33  ;;  %v362_v38 = vpop.permute.xlu1 %361 }
 0x358   :  { %v356_v36 = vmul.f32 -0.5, %v355_v35 }
 0x35a   :  { %v357_v37 = vmul.f32 %v356_v36, %v355_v35 }
 0x35c   :  { %v364_v39 = vsub.f32 %v357_v37, %v362_v38 }
 0x35e   :  { %v391_v40 = vadd.f32 -0.9189385, %v364_v39 }
 0x360   :  { %367 = vrot.lane.b32.xlu0 %v391_v40, %s675_s2 }
 0x3d2   :  { %v368_v41 = vpop.permute.xlu0 %367 }
 0x3d3   :  { %v371_v42 = vsel %vm370_vm3, %v348_v32, %v368_v41 }
 0x3d4   :  { %372 = vst [vmem:[#allocation8] sm:$0xff] %v371_v42 }
 0x3d5   :  { %650 = shalt.err (!%p647_p0)
}
 0x3d6   :  { %s651_s26 = scalar_lea.hbm %s782_s3, 128 }
 0x3d7   :  { %p652_p1 = scmp.ne.s32.totalorder %s782_s3, %s651_s26  ;;  %p655_p2 = scmp.lt.u32.totalorder %s651_s26, %s782_s3 }
 0x3d9   :  { %p657_p3 = pnand %p655_p2, %p652_p1 }
 0x3db   :  { %660 = shalt.err (!%p657_p3)
}
 0x3dc   :  { %382 = dma.vmem_to_hbm [thread:$0]  %s380_s22, 128, %s782_s3, [#allocation4]  }
 0x3dd   :  { %665 = dma.done.wait [#allocation4], 128  }
 0x3de   :  { %666 = vsyncadd [#allocation4], 4294967168 }
 0x3df   :  { %386 = vsyncpa [#allocation3], 1 }
 0x3e0   :  { %387 = vsyncpa [#allocation6], 1 }
 0x3e1   :  { %388 = vsyncpa [#allocation4], 1 }

</bundles_post_ra>
